<compile_context>
chip_gen: v7x
topology: tpu7x:2x2x1
jax: 0.10.0
libtpu: 0.0.40
codegen_flags: <defaults>
</compile_context>

<pallas_src>
import jax
import jax.numpy as jnp
import numpy as np
from jax.experimental import pallas as pl
from jax.experimental.pallas import tpu as pltpu


def _round_up(x, m):
    return (x + m - 1) // m * m


def _cdiv(a, b):
    return (a + b - 1) // b


def _critic_kernel(s_ref, a_ref, w1s_ref, w1a_ref, b1_ref, w2_ref, b2_ref,
                   w3_ref, b3_ref, w4_ref, b4_ref, out_ref):
    """One batch tile of the critic MLP (f32 accumulation throughout)."""
    cdt = w2_ref.dtype  # MXU operand dtype (f32 or bf16)

    # Layer 1 -- fused concat: [s, a] @ W1 == s @ W1s + a @ W1a
    h = jnp.dot(s_ref[...].astype(cdt), w1s_ref[...],
                preferred_element_type=jnp.float32)
    h = h + jnp.dot(a_ref[...].astype(cdt), w1a_ref[...],
                    preferred_element_type=jnp.float32)
    h = jnp.maximum(h + b1_ref[...], 0.0)

    # Layer 2
    h = jnp.dot(h.astype(cdt), w2_ref[...],
                preferred_element_type=jnp.float32) + b2_ref[...]
    h = jnp.maximum(h, 0.0)

    # Layer 3
    h = jnp.dot(h.astype(cdt), w3_ref[...],
                preferred_element_type=jnp.float32) + b3_ref[...]
    h = jnp.maximum(h, 0.0)

    # Output head (out_features == 1): multiply + lane reduce on the XLU so a
    # K=Hp, N=1 matmul does not occupy a full MXU pass.
    q = jnp.sum(h * w4_ref[...], axis=-1, keepdims=True) + b4_ref[...]
    out_ref[...] = q.astype(out_ref.dtype)


def _choose_batch_tile(B, block_b, sublane):
    """Adaptive batch tile: sublane-aligned, <= block_b, >=2 grid steps when
    the batch allows (v7x megacore), minimal padded-row waste."""
    block_b = max(sublane, (block_b // sublane) * sublane)
    if B <= sublane:
        return sublane
    min_steps = 2 if B >= 2 * sublane else 1
    n_steps = max(min_steps, _cdiv(B, block_b))
    tb = _round_up(_cdiv(B, n_steps), sublane)
    return min(tb, block_b)


def critic_forward(state, action, params, *, block_b=512):
    """Critic MLP forward.  `params` must come from `pad_critic_params`."""
    (w1s, w1a, b1, w2, b2, w3, b3, w4, b4) = params
    B, S = state.shape
    A = action.shape[1]
    assert w1s.shape[0] == S and w1a.shape[0] == A
    Hp = w2.shape[0]

    sublane = 16 if w2.dtype == jnp.bfloat16 else 8
    TB = _choose_batch_tile(B, block_b, sublane)
    Bp = _round_up(B, TB)
    if Bp != B:
        # Bounded zero-pad (< sublane * n_steps rows); padded rows stay finite
        # through the MLP and are sliced off below.
        state = jnp.pad(state, ((0, Bp - B), (0, 0)))
        action = jnp.pad(action, ((0, Bp - B), (0, 0)))
    grid = (Bp // TB,)

    residents = (w1s, w1a, b1, w2, b2, w3, b3, w4, b4)

    def _itemsize(a):
        return np.dtype(a.dtype).itemsize

    # ---- explicit VMEM budget (generous upper bound), capped by physical ----
    resident_bytes = sum(int(a.size) * _itemsize(a) for a in residents)
    est = int(
        2 * resident_bytes                        # weights/biases (2-buffer bound)
        + 3 * TB * (S + A) * _itemsize(state)     # pipelined input blocks
        + 3 * TB * 4                              # pipelined output blocks
        + 8 * TB * Hp * 4                         # f32 activation temporaries + slack
        + (4 << 20))                              # headroom
    try:
        phys_vmem = pltpu.get_tpu_info().vmem_capacity_bytes
    except Exception:
        phys_vmem = 64 << 20                      # v7x-safe fallback
    vmem_limit = min(int(phys_vmem * 0.9), max(32 << 20, est))

    # ---- advisory cost so XLA overlaps this call with the rest of DDPG ----
    flops = 2 * Bp * Hp * (S + A + 2 * Hp + 1)
    bytes_accessed = int(Bp * (S + A) * _itemsize(state) + resident_bytes + Bp * 4)
    cost = pl.CostEstimate(flops=flops, transcendentals=0,
                           bytes_accessed=bytes_accessed)

    compiler_params = pltpu.CompilerParams(
        dimension_semantics=("parallel",),
        vmem_limit_bytes=vmem_limit,
    )

    state_spec = pl.BlockSpec((TB, S), lambda i: (i, 0))
    action_spec = pl.BlockSpec((TB, A), lambda i: (i, 0))
    out_spec = pl.BlockSpec((TB, 1), lambda i: (i, 0))

    def run(single_buffer_weights):
        def resident_spec(arr):
            # Constant block index -> fetched once, VMEM-resident across the
            # whole grid.  Buffered(1): no dead second buffer for tensors
            # whose block never changes.
            if single_buffer_weights:
                return pl.BlockSpec(arr.shape, lambda i: (0, 0),
                                    pipeline_mode=pl.Buffered(1))
            return pl.BlockSpec(arr.shape, lambda i: (0, 0))

        return pl.pallas_call(
            _critic_kernel,
            out_shape=jax.ShapeDtypeStruct((Bp, 1), jnp.float32),
            grid=grid,
            in_specs=[state_spec, action_spec]
                     + [resident_spec(a) for a in residents],
            out_specs=out_spec,
            compiler_params=compiler_params,
            cost_estimate=cost,
        )(state, action, *residents)

    try:
        q = run(single_buffer_weights=True)
    except Exception:
        # pipeline_mode=pl.Buffered(1) not supported on this jax/Mosaic build;
        # fall back to default double-buffered resident weights.
        q = run(single_buffer_weights=False)

    return q[:B]


def init_critic_params(key, state_dim, action_dim, hidden_dim):
    """nn.Linear-style U(-1/sqrt(fan_in), +1/sqrt(fan_in)) init, (in,out) layout."""
    def linear(k, fan_in, fan_out):
        kw, kb = jax.random.split(k)
        bound = 1.0 / float(np.sqrt(fan_in))
        w = jax.random.uniform(kw, (fan_in, fan_out), jnp.float32, -bound, bound)
        b = jax.random.uniform(kb, (fan_out,), jnp.float32, -bound, bound)
        return w, b

    k1, k2, k3, k4 = jax.random.split(key, 4)
    w1, b1 = linear(k1, state_dim + action_dim, hidden_dim)
    w2, b2 = linear(k2, hidden_dim, hidden_dim)
    w3, b3 = linear(k3, hidden_dim, hidden_dim)
    w4, b4 = linear(k4, hidden_dim, 1)
    return (w1, b1, w2, b2, w3, b3, w4, b4)


def pad_critic_params(params, state_dim, weight_dtype=jnp.float32):
    """Kernel parameter layout.

    * Hidden width zero-padded to a multiple of 128 lanes (zero weight+bias in
      padded columns -> ReLU keeps them exactly 0; numerics unchanged).
    * W1 split into state / action halves so the torch.cat is fused into two
      small-K matmuls (no (B, S+A) concat stream).
    * Weights stored (in, out) (transposed vs nn.Linear).  Use
      weight_dtype=jnp.bfloat16 on v6e/v7x for full-rate MXU + half the weight
      VMEM/DMA; biases, the output head and elementwise math stay f32.
    """
    w1, b1, w2, b2, w3, b3, w4, b4 = params
    H = w1.shape[1]
    Hp = _round_up(H, 128)
    p = Hp - H

    w1s = jnp.pad(w1[:state_dim], ((0, 0), (0, p))).astype(weight_dtype)
    w1a = jnp.pad(w1[state_dim:], ((0, 0), (0, p))).astype(weight_dtype)
    b1p = jnp.pad(b1, (0, p)).reshape(1, Hp).astype(jnp.float32)
    w2p = jnp.pad(w2, ((0, p), (0, p))).astype(weight_dtype)
    b2p = jnp.pad(b2, (0, p)).reshape(1, Hp).astype(jnp.float32)
    w3p = jnp.pad(w3, ((0, p), (0, p))).astype(weight_dtype)
    b3p = jnp.pad(b3, (0, p)).reshape(1, Hp).astype(jnp.float32)
    w4p = jnp.pad(w4[:, 0], (0, p)).reshape(1, Hp).astype(jnp.float32)
    b4p = b4.reshape(1, 1).astype(jnp.float32)
    return (w1s, w1a, b1p, w2p, b2p, w3p, b3p, w4p, b4p)


def critic_reference(state, action, params):
    w1, b1, w2, b2, w3, b3, w4, b4 = params
    hp = jax.lax.Precision.HIGHEST
    sa = jnp.concatenate([state, action], axis=1)
    h = jax.nn.relu(jnp.dot(sa, w1, precision=hp) + b1)
    h = jax.nn.relu(jnp.dot(h, w2, precision=hp) + b2)
    h = jax.nn.relu(jnp.dot(h, w3, precision=hp) + b3)
    return jnp.dot(h, w4, precision=hp) + b4


if __name__ == "__main__":
    batch, state_dim, action_dim, hidden_dim = 2, 8, 4, 32

    key = jax.random.PRNGKey(0)
    k_s, k_a, k_p = jax.random.split(key, 3)
    state = jax.random.normal(k_s, (batch, state_dim), jnp.float32)
    action = jax.random.normal(k_a, (batch, action_dim), jnp.float32)

    params = init_critic_params(k_p, state_dim, action_dim, hidden_dim)
    q_ref = jax.block_until_ready(critic_reference(state, action, params))

    # f32 weight path: tight correctness check.
    kparams_f32 = pad_critic_params(params, state_dim, weight_dtype=jnp.float32)
    q = jax.block_until_ready(critic_forward(state, action, kparams_f32))
    assert q.shape == (batch, 1)
    assert jnp.allclose(q, q_ref, atol=1e-4, rtol=1e-4), \
        float(jnp.max(jnp.abs(q - q_ref)))

    # bf16 weight/operand path (recommended default on v6e/v7x): loose tolerance.
    kparams_bf16 = pad_critic_params(params, state_dim, weight_dtype=jnp.bfloat16)
    q_bf16 = jax.block_until_ready(critic_forward(state, action, kparams_bf16))
    assert q_bf16.shape == (batch, 1)
    assert jnp.allclose(q_bf16, q_ref, atol=1e-1, rtol=1e-1), \
        float(jnp.max(jnp.abs(q_bf16 - q_ref)))

    print("KERNEL_OK")
</pallas_src>

<mosaic_0001>
module attributes {stable_mosaic.version = 11 : i64} {
  func.func @_critic_kernel(%arg0: i32, %arg1: memref<8x8xf32, #tpu.memory_space<vmem>>, %arg2: memref<8x4xf32, #tpu.memory_space<vmem>>, %arg3: memref<8x128xf32, #tpu.memory_space<vmem>>, %arg4: memref<4x128xf32, #tpu.memory_space<vmem>>, %arg5: memref<1x128xf32, #tpu.memory_space<vmem>>, %arg6: memref<128x128xf32, #tpu.memory_space<vmem>>, %arg7: memref<1x128xf32, #tpu.memory_space<vmem>>, %arg8: memref<128x128xf32, #tpu.memory_space<vmem>>, %arg9: memref<1x128xf32, #tpu.memory_space<vmem>>, %arg10: memref<1x128xf32, #tpu.memory_space<vmem>>, %arg11: memref<1x1xf32, #tpu.memory_space<vmem>>, %arg12: memref<8x1xf32, #tpu.memory_space<vmem>>) attributes {dimension_semantics = [#tpu.dimension_semantics<parallel>], iteration_bounds = array<i64: 1>, scalar_prefetch = 0 : i64, scratch_operands = 0 : i64, tpu.core_type = #tpu.core_type<tc>, window_params = [{transform_indices = @transform_0, window_bounds = array<i64: 8, 8>}, {transform_indices = @transform_1, window_bounds = array<i64: 8, 4>}, {pipeline_mode = #tpu.pipeline_mode<synchronous>, transform_indices = @transform_2, window_bounds = array<i64: 8, 128>}, {pipeline_mode = #tpu.pipeline_mode<synchronous>, transform_indices = @transform_3, window_bounds = array<i64: 4, 128>}, {pipeline_mode = #tpu.pipeline_mode<synchronous>, transform_indices = @transform_4, window_bounds = array<i64: 1, 128>}, {pipeline_mode = #tpu.pipeline_mode<synchronous>, transform_indices = @transform_5, window_bounds = array<i64: 128, 128>}, {pipeline_mode = #tpu.pipeline_mode<synchronous>, transform_indices = @transform_6, window_bounds = array<i64: 1, 128>}, {pipeline_mode = #tpu.pipeline_mode<synchronous>, transform_indices = @transform_7, window_bounds = array<i64: 128, 128>}, {pipeline_mode = #tpu.pipeline_mode<synchronous>, transform_indices = @transform_8, window_bounds = array<i64: 1, 128>}, {pipeline_mode = #tpu.pipeline_mode<synchronous>, transform_indices = @transform_9, window_bounds = array<i64: 1, 128>}, {pipeline_mode = #tpu.pipeline_mode<synchronous>, transform_indices = @transform_10, window_bounds = array<i64: 1, 1>}, {transform_indices = @transform_11, window_bounds = array<i64: 8, 1>}]} {
    %c0 = arith.constant 0 : index
    %c0_0 = arith.constant 0 : index
    %0 = vector.load %arg1[%c0, %c0_0] : memref<8x8xf32, #tpu.memory_space<vmem>>, vector<8x8xf32>
    %c0_1 = arith.constant 0 : index
    %c0_2 = arith.constant 0 : index
    %1 = vector.load %arg3[%c0_1, %c0_2] : memref<8x128xf32, #tpu.memory_space<vmem>>, vector<8x128xf32>
    %cst = arith.constant dense<0.000000e+00> : vector<8x128xf32>
    %2 = tpu.matmul %0, %1, %cst {dimension_numbers = #tpu.dot_dimension_numbers<[1], [0], [0], [1], [0, 0, 1, 1], [], []>} : vector<8x8xf32>, vector<8x128xf32>, vector<8x128xf32> -> vector<8x128xf32>
    %c0_3 = arith.constant 0 : index
    %c0_4 = arith.constant 0 : index
    %3 = vector.load %arg2[%c0_3, %c0_4] : memref<8x4xf32, #tpu.memory_space<vmem>>, vector<8x4xf32>
    %c0_5 = arith.constant 0 : index
    %c0_6 = arith.constant 0 : index
    %4 = vector.load %arg4[%c0_5, %c0_6] : memref<4x128xf32, #tpu.memory_space<vmem>>, vector<4x128xf32>
    %cst_7 = arith.constant dense<0.000000e+00> : vector<8x128xf32>
    %5 = tpu.matmul %3, %4, %cst_7 {dimension_numbers = #tpu.dot_dimension_numbers<[1], [0], [0], [1], [0, 0, 1, 1], [], []>} : vector<8x4xf32>, vector<4x128xf32>, vector<8x128xf32> -> vector<8x128xf32>
    %6 = arith.addf %2, %5 : vector<8x128xf32>
    %c0_8 = arith.constant 0 : index
    %c0_9 = arith.constant 0 : index
    %7 = vector.load %arg5[%c0_8, %c0_9] : memref<1x128xf32, #tpu.memory_space<vmem>>, vector<1x128xf32>
    %8 = vector.broadcast %7 : vector<1x128xf32> to vector<8x128xf32>
    %9 = arith.addf %6, %8 : vector<8x128xf32>
    %cst_10 = arith.constant 0.000000e+00 : f32
    %10 = vector.broadcast %cst_10 : f32 to vector<8x128xf32>
    %11 = arith.maximumf %9, %10 : vector<8x128xf32>
    %c0_11 = arith.constant 0 : index
    %c0_12 = arith.constant 0 : index
    %12 = vector.load %arg6[%c0_11, %c0_12] : memref<128x128xf32, #tpu.memory_space<vmem>>, vector<128x128xf32>
    %cst_13 = arith.constant dense<0.000000e+00> : vector<8x128xf32>
    %13 = tpu.matmul %11, %12, %cst_13 {dimension_numbers = #tpu.dot_dimension_numbers<[1], [0], [0], [1], [0, 0, 1, 1], [], []>} : vector<8x128xf32>, vector<128x128xf32>, vector<8x128xf32> -> vector<8x128xf32>
    %c0_14 = arith.constant 0 : index
    %c0_15 = arith.constant 0 : index
    %14 = vector.load %arg7[%c0_14, %c0_15] : memref<1x128xf32, #tpu.memory_space<vmem>>, vector<1x128xf32>
    %15 = vector.broadcast %14 : vector<1x128xf32> to vector<8x128xf32>
    %16 = arith.addf %13, %15 : vector<8x128xf32>
    %cst_16 = arith.constant 0.000000e+00 : f32
    %17 = vector.broadcast %cst_16 : f32 to vector<8x128xf32>
    %18 = arith.maximumf %16, %17 : vector<8x128xf32>
    %c0_17 = arith.constant 0 : index
    %c0_18 = arith.constant 0 : index
    %19 = vector.load %arg8[%c0_17, %c0_18] : memref<128x128xf32, #tpu.memory_space<vmem>>, vector<128x128xf32>
    %cst_19 = arith.constant dense<0.000000e+00> : vector<8x128xf32>
    %20 = tpu.matmul %18, %19, %cst_19 {dimension_numbers = #tpu.dot_dimension_numbers<[1], [0], [0], [1], [0, 0, 1, 1], [], []>} : vector<8x128xf32>, vector<128x128xf32>, vector<8x128xf32> -> vector<8x128xf32>
    %c0_20 = arith.constant 0 : index
    %c0_21 = arith.constant 0 : index
    %21 = vector.load %arg9[%c0_20, %c0_21] : memref<1x128xf32, #tpu.memory_space<vmem>>, vector<1x128xf32>
    %22 = vector.broadcast %21 : vector<1x128xf32> to vector<8x128xf32>
    %23 = arith.addf %20, %22 : vector<8x128xf32>
    %cst_22 = arith.constant 0.000000e+00 : f32
    %24 = vector.broadcast %cst_22 : f32 to vector<8x128xf32>
    %25 = arith.maximumf %23, %24 : vector<8x128xf32>
    %c0_23 = arith.constant 0 : index
    %c0_24 = arith.constant 0 : index
    %26 = vector.load %arg10[%c0_23, %c0_24] : memref<1x128xf32, #tpu.memory_space<vmem>>, vector<1x128xf32>
    %27 = vector.broadcast %26 : vector<1x128xf32> to vector<8x128xf32>
    %28 = arith.mulf %25, %27 : vector<8x128xf32>
    %cst_25 = arith.constant dense<0.000000e+00> : vector<8xf32>
    %29 = vector.multi_reduction <add>, %28, %cst_25 [1] : vector<8x128xf32> to vector<8xf32>
    %30 = vector.shape_cast %29 : vector<8xf32> to vector<8x1xf32>
    %c0_26 = arith.constant 0 : index
    %c0_27 = arith.constant 0 : index
    %31 = vector.load %arg11[%c0_26, %c0_27] : memref<1x1xf32, #tpu.memory_space<vmem>>, vector<1x1xf32>
    %32 = vector.broadcast %31 : vector<1x1xf32> to vector<8x1xf32>
    %33 = arith.addf %30, %32 : vector<8x1xf32>
    %c0_28 = arith.constant 0 : index
    %c0_29 = arith.constant 0 : index
    %34 = vector.load %arg12[%c0_28, %c0_29] : memref<8x1xf32, #tpu.memory_space<vmem>>, vector<8x1xf32>
    tpu.vector_store %arg12[%c0_28, %c0_29], %33 {strides = array<i32>} : memref<8x1xf32, #tpu.memory_space<vmem>>, vector<8x1xf32>,
    return
  }
  func.func @transform_0(%arg0: i32) -> (i32, i32) {
    %c0_i32 = arith.constant 0 : i32
    %c0_i32_0 = arith.constant 0 : i32
    return %arg0, %c0_i32 : i32, i32
  }
  func.func @transform_1(%arg0: i32) -> (i32, i32) {
    %c0_i32 = arith.constant 0 : i32
    %c0_i32_0 = arith.constant 0 : i32
    return %arg0, %c0_i32 : i32, i32
  }
  func.func @transform_2(%arg0: i32) -> (i32, i32) {
    %c0_i32 = arith.constant 0 : i32
    %c0_i32_0 = arith.constant 0 : i32
    %c0_i32_1 = arith.constant 0 : i32
    return %c0_i32, %c0_i32_0 : i32, i32
  }
  func.func @transform_3(%arg0: i32) -> (i32, i32) {
    %c0_i32 = arith.constant 0 : i32
    %c0_i32_0 = arith.constant 0 : i32
    %c0_i32_1 = arith.constant 0 : i32
    return %c0_i32, %c0_i32_0 : i32, i32
  }
  func.func @transform_4(%arg0: i32) -> (i32, i32) {
    %c0_i32 = arith.constant 0 : i32
    %c0_i32_0 = arith.constant 0 : i32
    %c0_i32_1 = arith.constant 0 : i32
    return %c0_i32, %c0_i32_0 : i32, i32
  }
  func.func @transform_5(%arg0: i32) -> (i32, i32) {
    %c0_i32 = arith.constant 0 : i32
    %c0_i32_0 = arith.constant 0 : i32
    %c0_i32_1 = arith.constant 0 : i32
    return %c0_i32, %c0_i32_0 : i32, i32
  }
  func.func @transform_6(%arg0: i32) -> (i32, i32) {
    %c0_i32 = arith.constant 0 : i32
    %c0_i32_0 = arith.constant 0 : i32
    %c0_i32_1 = arith.constant 0 : i32
    return %c0_i32, %c0_i32_0 : i32, i32
  }
  func.func @transform_7(%arg0: i32) -> (i32, i32) {
    %c0_i32 = arith.constant 0 : i32
    %c0_i32_0 = arith.constant 0 : i32
    %c0_i32_1 = arith.constant 0 : i32
    return %c0_i32, %c0_i32_0 : i32, i32
  }
  func.func @transform_8(%arg0: i32) -> (i32, i32) {
    %c0_i32 = arith.constant 0 : i32
    %c0_i32_0 = arith.constant 0 : i32
    %c0_i32_1 = arith.constant 0 : i32
    return %c0_i32, %c0_i32_0 : i32, i32
  }
  func.func @transform_9(%arg0: i32) -> (i32, i32) {
    %c0_i32 = arith.constant 0 : i32
    %c0_i32_0 = arith.constant 0 : i32
    %c0_i32_1 = arith.constant 0 : i32
    return %c0_i32, %c0_i32_0 : i32, i32
  }
  func.func @transform_10(%arg0: i32) -> (i32, i32) {
    %c0_i32 = arith.constant 0 : i32
    %c0_i32_0 = arith.constant 0 : i32
    %c0_i32_1 = arith.constant 0 : i32
    return %c0_i32, %c0_i32_0 : i32, i32
  }
  func.func @transform_11(%arg0: i32) -> (i32, i32) {
    %c0_i32 = arith.constant 0 : i32
    %c0_i32_0 = arith.constant 0 : i32
    return %arg0, %c0_i32 : i32, i32
  }
}

module attributes {stable_mosaic.version = 11 : i64} {
  func.func @_critic_kernel(%arg0: i32, %arg1: memref<8x8xf32, #tpu.memory_space<vmem>>, %arg2: memref<8x4xf32, #tpu.memory_space<vmem>>, %arg3: memref<8x128xf32, #tpu.memory_space<vmem>>, %arg4: memref<4x128xf32, #tpu.memory_space<vmem>>, %arg5: memref<1x128xf32, #tpu.memory_space<vmem>>, %arg6: memref<128x128xf32, #tpu.memory_space<vmem>>, %arg7: memref<1x128xf32, #tpu.memory_space<vmem>>, %arg8: memref<128x128xf32, #tpu.memory_space<vmem>>, %arg9: memref<1x128xf32, #tpu.memory_space<vmem>>, %arg10: memref<1x128xf32, #tpu.memory_space<vmem>>, %arg11: memref<1x1xf32, #tpu.memory_space<vmem>>, %arg12: memref<8x1xf32, #tpu.memory_space<vmem>>) attributes {dimension_semantics = [#tpu.dimension_semantics<parallel>], iteration_bounds = array<i64: 1>, scalar_prefetch = 0 : i64, scratch_operands = 0 : i64, tpu.core_type = #tpu.core_type<tc>, window_params = [{transform_indices = @transform_0, window_bounds = array<i64: 8, 8>}, {transform_indices = @transform_1, window_bounds = array<i64: 8, 4>}, {pipeline_mode = #tpu.pipeline_mode<synchronous>, transform_indices = @transform_2, window_bounds = array<i64: 8, 128>}, {pipeline_mode = #tpu.pipeline_mode<synchronous>, transform_indices = @transform_3, window_bounds = array<i64: 4, 128>}, {pipeline_mode = #tpu.pipeline_mode<synchronous>, transform_indices = @transform_4, window_bounds = array<i64: 1, 128>}, {pipeline_mode = #tpu.pipeline_mode<synchronous>, transform_indices = @transform_5, window_bounds = array<i64: 128, 128>}, {pipeline_mode = #tpu.pipeline_mode<synchronous>, transform_indices = @transform_6, window_bounds = array<i64: 1, 128>}, {pipeline_mode = #tpu.pipeline_mode<synchronous>, transform_indices = @transform_7, window_bounds = array<i64: 128, 128>}, {pipeline_mode = #tpu.pipeline_mode<synchronous>, transform_indices = @transform_8, window_bounds = array<i64: 1, 128>}, {pipeline_mode = #tpu.pipeline_mode<synchronous>, transform_indices = @transform_9, window_bounds = array<i64: 1, 128>}, {pipeline_mode = #tpu.pipeline_mode<synchronous>, transform_indices = @transform_10, window_bounds = array<i64: 1, 1>}, {transform_indices = @transform_11, window_bounds = array<i64: 8, 1>}]} {
    %c0 = arith.constant 0 : index
    %c0_0 = arith.constant 0 : index
    %0 = vector.load %arg1[%c0, %c0_0] : memref<8x8xf32, #tpu.memory_space<vmem>>, vector<8x8xf32>
    %c0_1 = arith.constant 0 : index
    %c0_2 = arith.constant 0 : index
    %1 = vector.load %arg3[%c0_1, %c0_2] : memref<8x128xf32, #tpu.memory_space<vmem>>, vector<8x128xf32>
    %cst = arith.constant dense<0.000000e+00> : vector<8x128xf32>
    %2 = tpu.matmul %0, %1, %cst {dimension_numbers = #tpu.dot_dimension_numbers<[1], [0], [0], [1], [0, 0, 1, 1], [], []>} : vector<8x8xf32>, vector<8x128xf32>, vector<8x128xf32> -> vector<8x128xf32>
    %c0_3 = arith.constant 0 : index
    %c0_4 = arith.constant 0 : index
    %3 = vector.load %arg2[%c0_3, %c0_4] : memref<8x4xf32, #tpu.memory_space<vmem>>, vector<8x4xf32>
    %c0_5 = arith.constant 0 : index
    %c0_6 = arith.constant 0 : index
    %4 = vector.load %arg4[%c0_5, %c0_6] : memref<4x128xf32, #tpu.memory_space<vmem>>, vector<4x128xf32>
    %cst_7 = arith.constant dense<0.000000e+00> : vector<8x128xf32>
    %5 = tpu.matmul %3, %4, %cst_7 {dimension_numbers = #tpu.dot_dimension_numbers<[1], [0], [0], [1], [0, 0, 1, 1], [], []>} : vector<8x4xf32>, vector<4x128xf32>, vector<8x128xf32> -> vector<8x128xf32>
    %6 = arith.addf %2, %5 : vector<8x128xf32>
    %c0_8 = arith.constant 0 : index
    %c0_9 = arith.constant 0 : index
    %7 = vector.load %arg5[%c0_8, %c0_9] : memref<1x128xf32, #tpu.memory_space<vmem>>, vector<1x128xf32>
    %8 = vector.broadcast %7 : vector<1x128xf32> to vector<8x128xf32>
    %9 = arith.addf %6, %8 : vector<8x128xf32>
    %cst_10 = arith.constant 0.000000e+00 : f32
    %10 = vector.broadcast %cst_10 : f32 to vector<8x128xf32>
    %11 = arith.maximumf %9, %10 : vector<8x128xf32>
    %c0_11 = arith.constant 0 : index
    %c0_12 = arith.constant 0 : index
    %12 = vector.load %arg6[%c0_11, %c0_12] : memref<128x128xf32, #tpu.memory_space<vmem>>, vector<128x128xf32>
    %cst_13 = arith.constant dense<0.000000e+00> : vector<8x128xf32>
    %13 = tpu.matmul %11, %12, %cst_13 {dimension_numbers = #tpu.dot_dimension_numbers<[1], [0], [0], [1], [0, 0, 1, 1], [], []>} : vector<8x128xf32>, vector<128x128xf32>, vector<8x128xf32> -> vector<8x128xf32>
    %c0_14 = arith.constant 0 : index
    %c0_15 = arith.constant 0 : index
    %14 = vector.load %arg7[%c0_14, %c0_15] : memref<1x128xf32, #tpu.memory_space<vmem>>, vector<1x128xf32>
    %15 = vector.broadcast %14 : vector<1x128xf32> to vector<8x128xf32>
    %16 = arith.addf %13, %15 : vector<8x128xf32>
    %cst_16 = arith.constant 0.000000e+00 : f32
    %17 = vector.broadcast %cst_16 : f32 to vector<8x128xf32>
    %18 = arith.maximumf %16, %17 : vector<8x128xf32>
    %c0_17 = arith.constant 0 : index
    %c0_18 = arith.constant 0 : index
    %19 = vector.load %arg8[%c0_17, %c0_18] : memref<128x128xf32, #tpu.memory_space<vmem>>, vector<128x128xf32>
    %cst_19 = arith.constant dense<0.000000e+00> : vector<8x128xf32>
    %20 = tpu.matmul %18, %19, %cst_19 {dimension_numbers = #tpu.dot_dimension_numbers<[1], [0], [0], [1], [0, 0, 1, 1], [], []>} : vector<8x128xf32>, vector<128x128xf32>, vector<8x128xf32> -> vector<8x128xf32>
    %c0_20 = arith.constant 0 : index
    %c0_21 = arith.constant 0 : index
    %21 = vector.load %arg9[%c0_20, %c0_21] : memref<1x128xf32, #tpu.memory_space<vmem>>, vector<1x128xf32>
    %22 = vector.broadcast %21 : vector<1x128xf32> to vector<8x128xf32>
    %23 = arith.addf %20, %22 : vector<8x128xf32>
    %cst_22 = arith.constant 0.000000e+00 : f32
    %24 = vector.broadcast %cst_22 : f32 to vector<8x128xf32>
    %25 = arith.maximumf %23, %24 : vector<8x128xf32>
    %c0_23 = arith.constant 0 : index
    %c0_24 = arith.constant 0 : index
    %26 = vector.load %arg10[%c0_23, %c0_24] : memref<1x128xf32, #tpu.memory_space<vmem>>, vector<1x128xf32>
    %27 = vector.broadcast %26 : vector<1x128xf32> to vector<8x128xf32>
    %28 = arith.mulf %25, %27 : vector<8x128xf32>
    %cst_25 = arith.constant dense<0.000000e+00> : vector<8xf32>
    %29 = vector.multi_reduction <add>, %28, %cst_25 [1] : vector<8x128xf32> to vector<8xf32>
    %30 = vector.shape_cast %29 : vector<8xf32> to vector<8x1xf32>
    %c0_26 = arith.constant 0 : index
    %c0_27 = arith.constant 0 : index
    %31 = vector.load %arg11[%c0_26, %c0_27] : memref<1x1xf32, #tpu.memory_space<vmem>>, vector<1x1xf32>
    %32 = vector.broadcast %31 : vector<1x1xf32> to vector<8x1xf32>
    %33 = arith.addf %30, %32 : vector<8x1xf32>
    %c0_28 = arith.constant 0 : index
    %c0_29 = arith.constant 0 : index
    %34 = vector.load %arg12[%c0_28, %c0_29] : memref<8x1xf32, #tpu.memory_space<vmem>>, vector<8x1xf32>
    tpu.vector_store %arg12[%c0_28, %c0_29], %33 {strides = array<i32>} : memref<8x1xf32, #tpu.memory_space<vmem>>, vector<8x1xf32>,
    return
  }
  func.func @transform_0(%arg0: i32) -> (i32, i32) {
    %c0_i32 = arith.constant 0 : i32
    %c0_i32_0 = arith.constant 0 : i32
    return %arg0, %c0_i32 : i32, i32
  }
  func.func @transform_1(%arg0: i32) -> (i32, i32) {
    %c0_i32 = arith.constant 0 : i32
    %c0_i32_0 = arith.constant 0 : i32
    return %arg0, %c0_i32 : i32, i32
  }
  func.func @transform_2(%arg0: i32) -> (i32, i32) {
    %c0_i32 = arith.constant 0 : i32
    %c0_i32_0 = arith.constant 0 : i32
    %c0_i32_1 = arith.constant 0 : i32
    return %c0_i32, %c0_i32_0 : i32, i32
  }
  func.func @transform_3(%arg0: i32) -> (i32, i32) {
    %c0_i32 = arith.constant 0 : i32
    %c0_i32_0 = arith.constant 0 : i32
    %c0_i32_1 = arith.constant 0 : i32
    return %c0_i32, %c0_i32_0 : i32, i32
  }
  func.func @transform_4(%arg0: i32) -> (i32, i32) {
    %c0_i32 = arith.constant 0 : i32
    %c0_i32_0 = arith.constant 0 : i32
    %c0_i32_1 = arith.constant 0 : i32
    return %c0_i32, %c0_i32_0 : i32, i32
  }
  func.func @transform_5(%arg0: i32) -> (i32, i32) {
    %c0_i32 = arith.constant 0 : i32
    %c0_i32_0 = arith.constant 0 : i32
    %c0_i32_1 = arith.constant 0 : i32
    return %c0_i32, %c0_i32_0 : i32, i32
  }
  func.func @transform_6(%arg0: i32) -> (i32, i32) {
    %c0_i32 = arith.constant 0 : i32
    %c0_i32_0 = arith.constant 0 : i32
    %c0_i32_1 = arith.constant 0 : i32
    return %c0_i32, %c0_i32_0 : i32, i32
  }
  func.func @transform_7(%arg0: i32) -> (i32, i32) {
    %c0_i32 = arith.constant 0 : i32
    %c0_i32_0 = arith.constant 0 : i32
    %c0_i32_1 = arith.constant 0 : i32
    return %c0_i32, %c0_i32_0 : i32, i32
  }
  func.func @transform_8(%arg0: i32) -> (i32, i32) {
    %c0_i32 = arith.constant 0 : i32
    %c0_i32_0 = arith.constant 0 : i32
    %c0_i32_1 = arith.constant 0 : i32
    return %c0_i32, %c0_i32_0 : i32, i32
  }
  func.func @transform_9(%arg0: i32) -> (i32, i32) {
    %c0_i32 = arith.constant 0 : i32
    %c0_i32_0 = arith.constant 0 : i32
    %c0_i32_1 = arith.constant 0 : i32
    return %c0_i32, %c0_i32_0 : i32, i32
  }
  func.func @transform_10(%arg0: i32) -> (i32, i32) {
    %c0_i32 = arith.constant 0 : i32
    %c0_i32_0 = arith.constant 0 : i32
    %c0_i32_1 = arith.constant 0 : i32
    return %c0_i32, %c0_i32_0 : i32, i32
  }
  func.func @transform_11(%arg0: i32) -> (i32, i32) {
    %c0_i32 = arith.constant 0 : i32
    %c0_i32_0 = arith.constant 0 : i32
    return %arg0, %c0_i32 : i32, i32
  }
}

</mosaic_0001>

<bundles_post_ra>
// kernel: tpu_custom_call.1
= control target key start
LH: loop header
LB: loop body
LE: loop exit
PB: predicated region body
PF: predicated region fallthrough
CT: control target
= control target key end

     0   :  { %s817_s0 = inlined_call_operand.vmem [shape: f32[8,8], index: 0, kind: input, shape index: {}]   ;;  %s818_s1 = inlined_call_operand.vmem [shape: f32[8,4], index: 1, kind: input, shape index: {}]   ;;  %s819_s2 = inlined_call_operand.vmem [shape: f32[8,128], index: 2, kind: input, shape index: {}]   ;;  %s820_s3 = inlined_call_operand.vmem [shape: f32[4,128], index: 3, kind: input, shape index: {}]   ;;  %s821_s4 = inlined_call_operand.vmem [shape: f32[1,128], index: 4, kind: input, shape index: {}]   ;;  %s822_s5 = inlined_call_operand.hbm [shape: f32[128,128], index: 5, kind: input, shape index: {}]   ;;  %s823_s6 = inlined_call_operand.vmem [shape: f32[1,128], index: 6, kind: input, shape index: {}]   ;;  %s824_s7 = inlined_call_operand.hbm [shape: f32[128,128], index: 7, kind: input, shape index: {}]   ;;  %s825_s8 = inlined_call_operand.vmem [shape: f32[1,128], index: 8, kind: input, shape index: {}]   ;;  %s826_s9 = inlined_call_operand.vmem [shape: f32[1,128], index: 9, kind: input, shape index: {}]   ;;  %s827_s10 = inlined_call_operand.<no memory space> [shape: f32[1,1], index: 10, kind: input, shape index: {}]   ;;  %s828_s11 = inlined_call_operand.vmem [shape: f32[8,1], index: 11, kind: output, shape index: {}]  }
   0x1   :  { %v16_v0 = vstv %s827_s10 }
   0x2   :  { %17 = vst [vmem:[#allocation2] sm:$0x1] %v16_v0 }
   0x3   :  { %18 = vsyncpa [#allocation4], 0 }
   0x4   :  { %19 = vsyncpa [#allocation6], 0  ;;  %s676_s19 = smov [#allocation3]   ;;  %s628_s23 = scalar_lea.hbm %s822_s5, 2048 }
   0x5   :  { %s35_s20 = sshll.u32 %s676_s19, 4  ;;  %p629_p0 = scmp.ne.s32.totalorder %s822_s5, %s628_s23  ;;  %s36_s20 = int_to_ptr.vmem [resolvable:$true] %s35_s20 }
   0x6   :  { %p632_p1 = scmp.lt.u32.totalorder %s628_s23, %s822_s5 }
   0x8   :  { %p634_p2 = pnand %p632_p1, %p629_p0 }
   0xa   :  { %637 = shalt.err (!%p634_p2)
}
   0xb   :  { %s638_s10 = scalar_lea.vmem %s36_s20, 2048  ;;  %p643_p4 = scmp.lt.s32.totalorder %s36_s20, %s36_s20 }
   0xc   :  { %p639_p3 = scmp.ne.s32.totalorder %s36_s20, %s638_s10  ;;  %p644_p5 = scmp.lt.s32.totalorder %s638_s10, %s638_s10 }
   0xe   :  { %p645_p6 = por %p644_p5, %p643_p4 }
  0x10   :  { %p646_p7 = pnand %p645_p6, %p639_p3 }
  0x12   :  { %649 = shalt.err (!%p646_p7)
}
  0x13   :  { %s677_s28 = smov 128   ;;  %s678_s29 = smov 8  }
  0x14   :  { %41 = dma.hbm_to_vmem [thread:$0]  %s822_s5, 2048, %s36_s20, [#allocation4], %s677_s28, %s677_s28, %s678_s29  }
  0x15   :  { %s679_s13 = smov [#allocation5]   ;;  %s650_s17 = scalar_lea.hbm %s824_s7, 2048 }
  0x16   :  { %s49_s14 = sshll.u32 %s679_s13, 4  ;;  %p651_p8 = scmp.ne.s32.totalorder %s824_s7, %s650_s17  ;;  %s50_s14 = int_to_ptr.vmem [resolvable:$true] %s49_s14 }
  0x17   :  { %p654_p9 = scmp.lt.u32.totalorder %s650_s17, %s824_s7 }
  0x19   :  { %p656_p10 = pnand %p654_p9, %p651_p8 }
  0x1b   :  { %659 = shalt.err (!%p656_p10)
}
  0x1c   :  { %s660_s23 = scalar_lea.vmem %s50_s14, 2048  ;;  %p665_p12 = scmp.lt.s32.totalorder %s50_s14, %s50_s14 }
  0x1d   :  { %p661_p11 = scmp.ne.s32.totalorder %s50_s14, %s660_s23  ;;  %p666_p13 = scmp.lt.s32.totalorder %s660_s23, %s660_s23 }
  0x1f   :  { %p667_p0 = por %p666_p13, %p665_p12 }
  0x21   :  { %p668_p1 = pnand %p667_p0, %p661_p11 }
  0x23   :  { %671 = shalt.err (!%p668_p1)
}
  0x24   :  { %55 = dma.hbm_to_vmem [thread:$0]  %s824_s7, 2048, %s50_s14, [#allocation6], %s677_s28, %s677_s28, %s678_s29  }
  0x25   :  { %672 = dma.done.wait [#allocation4], 2048  }
  0x26   :  { %673 = vsyncadd [#allocation4], 4294965248 }
  0x27   :  { %674 = dma.done.wait [#allocation6], 2048  }
  0x28   :  { %675 = vsyncadd [#allocation6], 4294965248  ;;  %v680_v1 = vmov 0.0   ;;  %vm681_vm0 = vmmov 0   ;;  %vm76_vm1 = vcmask 1043456   ;;  %vm72_vm2 = vcmask 31744  }
  0x29   :  { %493 = vmatprep.subr.mxu0 %v680_v1  ;;  %498 = vmatprep.subr.mxu1 %v680_v1  ;;  %vm150_vm3 = vcmask 64512   ;;  %v71_v2 = vld [vmem:[%s820_s3] sm:$0xf]  ;;  %v234_v7 = vld [vmem:[#allocation3 + $0x8] sm:$0xff]  ;;  %v235_v9 = vld [vmem:[#allocation3 + $0x10] sm:$0xff]  ;;  %v682_v11 = vmov 0.0|0.0  }
  0x2a   :  { %495 = vmatprep.mubr.msk.f32.mxu0 %vm681_vm0, %v680_v1  ;;  %500 = vmatprep.mubr.msk.f32.mxu1 %vm681_vm0, %v680_v1  ;;  %v69_v3 = vld [vmem:[%s819_s2] sm:$0xff]  ;;  %v238_v14 = vld [vmem:[#allocation3 + $0x28] sm:$0xff]  ;;  %v239_v16 = vld [vmem:[#allocation3 + $0x30] sm:$0xff]  ;;  %vm439_vm4 = vcmask 7168  }
  0x2b   :  { %v70_v4 = vld [vmem:[%s818_s1] sm:$0xff]  ;;  %494 = vmatpush3.msk.msra.mxu0 %vm76_vm1, %v71_v2  ;;  %499 = vmatpush3.msra.mxu1 %v69_v3  ;;  %v242_v20 = vld [vmem:[#allocation3 + $0x48] sm:$0xff]  ;;  %v243_v22 = vld [vmem:[#allocation3 + $0x50] sm:$0xff] }
  0x2c   :  { %v68_v5 = vld [vmem:[%s817_s0] sm:$0xff]  ;;  %496 = vmatmul.mubr.msk.f32.vlgmr.msra.gmra.mrb[0].mxu0 %vm72_vm2, %v70_v4  ;;  %573 = vmatprep.subr.bf16.mxu0 %v682_v11  ;;  %v246_v26 = vld [vmem:[#allocation3 + $0x68] sm:$0xff]  ;;  %v247_v28 = vld [vmem:[#allocation3 + $0x70] sm:$0xff] }
  0x2d   :  { %v233_v6 = vld [vmem:[#allocation3] sm:$0xff]  ;;  %501 = vmatmul.mubr.msk.f32.vlgmr.msra.gmra.mrb[0].mxu1 %vm150_vm3, %v68_v5  ;;  %v236_v10 = vld [vmem:[#allocation3 + $0x18] sm:$0xff]  ;;  %535 = vmatprep.mubr.msk.f32.mxu0 %vm681_vm0, %v680_v1  ;;  %v328_v32 = vld [vmem:[#allocation5 + $0x8] sm:$0xff] }
  0x2e   :  { %v574_v8 = vpack.c.bf16 %v234_v7, %v233_v6  ;;  %v577_v12 = vpack.c.bf16 %v236_v10, %v235_v9  ;;  %597 = vmatprep.subr.bf16.mxu1 %v682_v11  ;;  %v237_v13 = vld [vmem:[#allocation3 + $0x20] sm:$0xff]  ;;  %570 = vmatprep.mubr.msk.f32.mxu1 %vm681_vm0, %v680_v1  ;;  %v240_v17 = vld [vmem:[#allocation3 + $0x38] sm:$0xff]  ;;  %v329_v33 = vld [vmem:[#allocation5 + $0x10] sm:$0xff] }
  0x2f   :  { %v580_v15 = vpack.c.bf16 %v238_v14, %v237_v13  ;;  %v583_v18 = vpack.c.bf16 %v240_v17, %v239_v16  ;;  %v241_v19 = vld [vmem:[#allocation3 + $0x40] sm:$0xff]  ;;  %v244_v23 = vld [vmem:[#allocation3 + $0x58] sm:$0xff]  ;;  %v332_v38 = vld [vmem:[#allocation5 + $0x28] sm:$0xff] }
  0x30   :  { %575 = vmatpush3.bf16.msra.mxu0 %v574_v8  ;;  %v586_v21 = vpack.c.bf16 %v242_v20, %v241_v19  ;;  %v589_v24 = vpack.c.bf16 %v244_v23, %v243_v22  ;;  %v245_v25 = vld [vmem:[#allocation3 + $0x60] sm:$0xff]  ;;  %v248_v29 = vld [vmem:[#allocation3 + $0x78] sm:$0xff]  ;;  %v333_v40 = vld [vmem:[#allocation5 + $0x30] sm:$0xff] }
  0x31   :  { %576 = vmatprep.subr.bf16.mxu0 %v682_v11  ;;  %v592_v27 = vpack.c.bf16 %v246_v26, %v245_v25  ;;  %v595_v30 = vpack.c.bf16 %v248_v29, %v247_v28  ;;  %v327_v31 = vld [vmem:[#allocation5] sm:$0xff]  ;;  %v330_v35 = vld [vmem:[#allocation5 + $0x18] sm:$0xff]  ;;  %v336_v44 = vld [vmem:[#allocation5 + $0x48] sm:$0xff] }
  0x32   :  { %v598_v34 = vpack.c.bf16 %v328_v32, %v327_v31  ;;  %v601_v36 = vpack.c.bf16 %v330_v35, %v329_v33  ;;  %v331_v37 = vld [vmem:[#allocation5 + $0x20] sm:$0xff]  ;;  %v334_v41 = vld [vmem:[#allocation5 + $0x38] sm:$0xff]  ;;  %v337_v46 = vld [vmem:[#allocation5 + $0x50] sm:$0xff] }
  0x33   :  { %v604_v39 = vpack.c.bf16 %v332_v38, %v331_v37  ;;  %v607_v42 = vpack.c.bf16 %v334_v41, %v333_v40  ;;  %v335_v43 = vld [vmem:[#allocation5 + $0x40] sm:$0xff]  ;;  %v338_v47 = vld [vmem:[#allocation5 + $0x58] sm:$0xff]  ;;  %v340_v50 = vld [vmem:[#allocation5 + $0x68] sm:$0xff] }
  0x34   :  { %578 = vmatpush3.bf16.msra.mxu0 %v577_v12  ;;  %599 = vmatpush3.bf16.msra.mxu1 %v598_v34  ;;  %v610_v45 = vpack.c.bf16 %v336_v44, %v335_v43  ;;  %v613_v48 = vpack.c.bf16 %v338_v47, %v337_v46  ;;  %v339_v49 = vld [vmem:[#allocation5 + $0x60] sm:$0xff]  ;;  %v450_v54 = vld [vmem:[%s821_s4] ss:$0 sm:$0xff]  ;;  %v341_v60 = vld [vmem:[#allocation5 + $0x70] sm:$0xff] }
  0x35   :  { %579 = vmatprep.subr.bf16.mxu0 %v682_v11  ;;  %600 = vmatprep.subr.bf16.mxu1 %v682_v11  ;;  %v616_v51 = vpack.c.bf16 %v340_v50, %v339_v49  ;;  %v342_v61 = vld [vmem:[#allocation5 + $0x78] sm:$0xff] }
  0x36   :  { %v619_v62 = vpack.c.bf16 %v342_v61, %v341_v60  ;;  %v451_v63 = vld [vmem:[%s823_s6] ss:$0 sm:$0xff] }
  0x37   :  { %v452_v4 = vld [vmem:[%s825_s8] ss:$0 sm:$0xff] }
  0x38   :  { %581 = vmatpush3.bf16.msra.mxu0 %v580_v15  ;;  %602 = vmatpush3.bf16.msra.mxu1 %v601_v36  ;;  %v453_v8 = vld [vmem:[%s826_s9] ss:$0 sm:$0xff] }
  0x39   :  { %582 = vmatprep.subr.bf16.mxu0 %v682_v11  ;;  %603 = vmatprep.subr.bf16.mxu1 %v682_v11 }
  0x3c   :  { %584 = vmatpush3.bf16.msra.mxu0 %v583_v18  ;;  %605 = vmatpush3.bf16.msra.mxu1 %v604_v39 }
  0x3d   :  { %585 = vmatprep.subr.bf16.mxu0 %v682_v11  ;;  %606 = vmatprep.subr.bf16.mxu1 %v682_v11 }
  0x40   :  { %587 = vmatpush3.bf16.msra.mxu0 %v586_v21  ;;  %608 = vmatpush3.bf16.msra.mxu1 %v607_v42 }
  0x41   :  { %588 = vmatprep.subr.bf16.mxu0 %v682_v11  ;;  %609 = vmatprep.subr.bf16.mxu1 %v682_v11 }
  0x44   :  { %590 = vmatpush3.bf16.msra.mxu0 %v589_v24  ;;  %611 = vmatpush3.bf16.msra.mxu1 %v610_v45 }
  0x45   :  { %591 = vmatprep.subr.bf16.mxu0 %v682_v11  ;;  %612 = vmatprep.subr.bf16.mxu1 %v682_v11 }
  0x48   :  { %593 = vmatpush3.bf16.msra.mxu0 %v592_v27  ;;  %614 = vmatpush3.bf16.msra.mxu1 %v613_v48 }
  0x49   :  { %594 = vmatprep.subr.bf16.mxu0 %v682_v11  ;;  %615 = vmatprep.subr.bf16.mxu1 %v682_v11 }
  0x4c   :  { %596 = vmatpush3.bf16.msra.mxu0 %v595_v30  ;;  %617 = vmatpush3.bf16.msra.mxu1 %v616_v51 }
  0x4d   :  { %618 = vmatprep.subr.bf16.mxu1 %v682_v11  ;;  %v454_v11 = vld [vmem:[#allocation2] ss:$0 sm:$0xff] }
  0x50   :  { %620 = vmatpush3.bf16.msra.mxu1 %v619_v62 }
  0xff   :  { %v146_v52 = vpop.f32.mrb[0].mxu0 }
 0x100   :  { %v220_v53 = vpop.f32.mrb[0].mxu1  ;;  %v497_v56 = vpop.f32.mrb[1].mxu0 }
 0x101   :  { %v221_v55 = vadd.f32 %v220_v53, %v146_v52  ;;  %v502_v57 = vpop.f32.mrb[1].mxu1 }
 0x103   :  { %v231_v58 = vadd.f32 %v450_v54, %v221_v55 }
 0x105   :  { %v232_v59 = vmax.f32 %v231_v58, 0.0 }
 0x107   :  { %536 = vmatmul.mubr.f32.vlgmr.msra.gmra.mrb[2].mxu0 %v232_v59 }
 0x1da   :  { %v322_v0 = vpop.f32.mrb[2].mxu0 }
 0x1db   :  { %v323_v1 = vadd.f32 %v451_v63, %v322_v0  ;;  %v537_v2 = vpop.f32.mrb[3].mxu0 }
 0x1dd   :  { %v326_v3 = vmax.f32 %v323_v1, 0.0 }
 0x1df   :  { %571 = vmatmul.mubr.f32.vlgmr.msra.gmra.mrb[2].mxu1 %v326_v3 }
 0x2b2   :  { %v416_v5 = vpop.f32.mrb[2].mxu1 }
 0x2b3   :  { %v417_v6 = vadd.f32 %v452_v4, %v416_v5  ;;  %v572_v7 = vpop.f32.mrb[3].mxu1 }
 0x2b5   :  { %v420_v9 = vmax.f32 %v417_v6, 0.0 }
 0x2b7   :  { %v428_v10 = vmul.f32 %v453_v8, %v420_v9 }
 0x2b9   :  { %429 = vadd.xlane.f32.xlu0 %v428_v10 }
 0x346   :  { %v430_v12 = vpop.xlane.xlu0 %429 }
 0x347   :  { %v438_v13 = vadd.f32 %v454_v11, %v430_v12 }
 0x349   :  { %440 = vst.msk [vmem:[%s828_s11] sm:$0xff] %vm439_vm4, %v438_v13 }
 0x34a   :  { %445 = vsyncpa [#allocation4], 1 }
 0x34b   :  { %446 = vsyncpa [#allocation6], 1 }

// kernel: tpu_custom_call.1
= control target key start
LH: loop header
LB: loop body
LE: loop exit
PB: predicated region body
PF: predicated region fallthrough
CT: control target
= control target key end

     0   :  { %s817_s0 = inlined_call_operand.vmem [shape: f32[8,8], index: 0, kind: input, shape index: {}]   ;;  %s818_s1 = inlined_call_operand.vmem [shape: f32[8,4], index: 1, kind: input, shape index: {}]   ;;  %s819_s2 = inlined_call_operand.vmem [shape: f32[8,128], index: 2, kind: input, shape index: {}]   ;;  %s820_s3 = inlined_call_operand.vmem [shape: f32[4,128], index: 3, kind: input, shape index: {}]   ;;  %s821_s4 = inlined_call_operand.vmem [shape: f32[1,128], index: 4, kind: input, shape index: {}]   ;;  %s822_s5 = inlined_call_operand.hbm [shape: f32[128,128], index: 5, kind: input, shape index: {}]   ;;  %s823_s6 = inlined_call_operand.vmem [shape: f32[1,128], index: 6, kind: input, shape index: {}]   ;;  %s824_s7 = inlined_call_operand.hbm [shape: f32[128,128], index: 7, kind: input, shape index: {}]   ;;  %s825_s8 = inlined_call_operand.vmem [shape: f32[1,128], index: 8, kind: input, shape index: {}]   ;;  %s826_s9 = inlined_call_operand.vmem [shape: f32[1,128], index: 9, kind: input, shape index: {}]   ;;  %s827_s10 = inlined_call_operand.<no memory space> [shape: f32[1,1], index: 10, kind: input, shape index: {}]   ;;  %s828_s11 = inlined_call_operand.vmem [shape: f32[8,1], index: 11, kind: output, shape index: {}]  }
   0x1   :  { %v16_v0 = vstv %s827_s10 }
   0x2   :  { %17 = vst [vmem:[#allocation2] sm:$0x1] %v16_v0 }
   0x3   :  { %18 = vsyncpa [#allocation4], 0 }
   0x4   :  { %19 = vsyncpa [#allocation6], 0  ;;  %s676_s19 = smov [#allocation3]   ;;  %s628_s23 = scalar_lea.hbm %s822_s5, 2048 }
   0x5   :  { %s35_s20 = sshll.u32 %s676_s19, 4  ;;  %p629_p0 = scmp.ne.s32.totalorder %s822_s5, %s628_s23  ;;  %s36_s20 = int_to_ptr.vmem [resolvable:$true] %s35_s20 }
   0x6   :  { %p632_p1 = scmp.lt.u32.totalorder %s628_s23, %s822_s5 }
   0x8   :  { %p634_p2 = pnand %p632_p1, %p629_p0 }
   0xa   :  { %637 = shalt.err (!%p634_p2)
}
   0xb   :  { %s638_s10 = scalar_lea.vmem %s36_s20, 2048  ;;  %p643_p4 = scmp.lt.s32.totalorder %s36_s20, %s36_s20 }
   0xc   :  { %p639_p3 = scmp.ne.s32.totalorder %s36_s20, %s638_s10  ;;  %p644_p5 = scmp.lt.s32.totalorder %s638_s10, %s638_s10 }
   0xe   :  { %p645_p6 = por %p644_p5, %p643_p4 }
  0x10   :  { %p646_p7 = pnand %p645_p6, %p639_p3 }
  0x12   :  { %649 = shalt.err (!%p646_p7)
}
  0x13   :  { %s677_s28 = smov 128   ;;  %s678_s29 = smov 8  }
  0x14   :  { %41 = dma.hbm_to_vmem [thread:$0]  %s822_s5, 2048, %s36_s20, [#allocation4], %s677_s28, %s677_s28, %s678_s29  }
  0x15   :  { %s679_s13 = smov [#allocation5]   ;;  %s650_s17 = scalar_lea.hbm %s824_s7, 2048 }
  0x16   :  { %s49_s14 = sshll.u32 %s679_s13, 4  ;;  %p651_p8 = scmp.ne.s32.totalorder %s824_s7, %s650_s17  ;;  %s50_s14 = int_to_ptr.vmem [resolvable:$true] %s49_s14 }
  0x17   :  { %p654_p9 = scmp.lt.u32.totalorder %s650_s17, %s824_s7 }
  0x19   :  { %p656_p10 = pnand %p654_p9, %p651_p8 }
  0x1b   :  { %659 = shalt.err (!%p656_p10)
}
  0x1c   :  { %s660_s23 = scalar_lea.vmem %s50_s14, 2048  ;;  %p665_p12 = scmp.lt.s32.totalorder %s50_s14, %s50_s14 }
  0x1d   :  { %p661_p11 = scmp.ne.s32.totalorder %s50_s14, %s660_s23  ;;  %p666_p13 = scmp.lt.s32.totalorder %s660_s23, %s660_s23 }
  0x1f   :  { %p667_p0 = por %p666_p13, %p665_p12 }
  0x21   :  { %p668_p1 = pnand %p667_p0, %p661_p11 }
  0x23   :  { %671 = shalt.err (!%p668_p1)
}
  0x24   :  { %55 = dma.hbm_to_vmem [thread:$0]  %s824_s7, 2048, %s50_s14, [#allocation6], %s677_s28, %s677_s28, %s678_s29  }
  0x25   :  { %672 = dma.done.wait [#allocation4], 2048  }
  0x26   :  { %673 = vsyncadd [#allocation4], 4294965248 }
  0x27   :  { %674 = dma.done.wait [#allocation6], 2048  }
  0x28   :  { %675 = vsyncadd [#allocation6], 4294965248  ;;  %v680_v1 = vmov 0.0   ;;  %vm681_vm0 = vmmov 0   ;;  %vm76_vm1 = vcmask 1043456   ;;  %vm72_vm2 = vcmask 31744  }
  0x29   :  { %493 = vmatprep.subr.mxu0 %v680_v1  ;;  %498 = vmatprep.subr.mxu1 %v680_v1  ;;  %vm150_vm3 = vcmask 64512   ;;  %v71_v2 = vld [vmem:[%s820_s3] sm:$0xf]  ;;  %v234_v7 = vld [vmem:[#allocation3 + $0x8] sm:$0xff]  ;;  %v235_v9 = vld [vmem:[#allocation3 + $0x10] sm:$0xff]  ;;  %v682_v11 = vmov 0.0|0.0  }
  0x2a   :  { %495 = vmatprep.mubr.msk.f32.mxu0 %vm681_vm0, %v680_v1  ;;  %500 = vmatprep.mubr.msk.f32.mxu1 %vm681_vm0, %v680_v1  ;;  %v69_v3 = vld [vmem:[%s819_s2] sm:$0xff]  ;;  %v238_v14 = vld [vmem:[#allocation3 + $0x28] sm:$0xff]  ;;  %v239_v16 = vld [vmem:[#allocation3 + $0x30] sm:$0xff]  ;;  %vm439_vm4 = vcmask 7168  }
  0x2b   :  { %v70_v4 = vld [vmem:[%s818_s1] sm:$0xff]  ;;  %494 = vmatpush3.msk.msra.mxu0 %vm76_vm1, %v71_v2  ;;  %499 = vmatpush3.msra.mxu1 %v69_v3  ;;  %v242_v20 = vld [vmem:[#allocation3 + $0x48] sm:$0xff]  ;;  %v243_v22 = vld [vmem:[#allocation3 + $0x50] sm:$0xff] }
  0x2c   :  { %v68_v5 = vld [vmem:[%s817_s0] sm:$0xff]  ;;  %496 = vmatmul.mubr.msk.f32.vlgmr.msra.gmra.mrb[0].mxu0 %vm72_vm2, %v70_v4  ;;  %573 = vmatprep.subr.bf16.mxu0 %v682_v11  ;;  %v246_v26 = vld [vmem:[#allocation3 + $0x68] sm:$0xff]  ;;  %v247_v28 = vld [vmem:[#allocation3 + $0x70] sm:$0xff] }
  0x2d   :  { %v233_v6 = vld [vmem:[#allocation3] sm:$0xff]  ;;  %501 = vmatmul.mubr.msk.f32.vlgmr.msra.gmra.mrb[0].mxu1 %vm150_vm3, %v68_v5  ;;  %v236_v10 = vld [vmem:[#allocation3 + $0x18] sm:$0xff]  ;;  %535 = vmatprep.mubr.msk.f32.mxu0 %vm681_vm0, %v680_v1  ;;  %v328_v32 = vld [vmem:[#allocation5 + $0x8] sm:$0xff] }
  0x2e   :  { %v574_v8 = vpack.c.bf16 %v234_v7, %v233_v6  ;;  %v577_v12 = vpack.c.bf16 %v236_v10, %v235_v9  ;;  %597 = vmatprep.subr.bf16.mxu1 %v682_v11  ;;  %v237_v13 = vld [vmem:[#allocation3 + $0x20] sm:$0xff]  ;;  %570 = vmatprep.mubr.msk.f32.mxu1 %vm681_vm0, %v680_v1  ;;  %v240_v17 = vld [vmem:[#allocation3 + $0x38] sm:$0xff]  ;;  %v329_v33 = vld [vmem:[#allocation5 + $0x10] sm:$0xff] }
  0x2f   :  { %v580_v15 = vpack.c.bf16 %v238_v14, %v237_v13  ;;  %v583_v18 = vpack.c.bf16 %v240_v17, %v239_v16  ;;  %v241_v19 = vld [vmem:[#allocation3 + $0x40] sm:$0xff]  ;;  %v244_v23 = vld [vmem:[#allocation3 + $0x58] sm:$0xff]  ;;  %v332_v38 = vld [vmem:[#allocation5 + $0x28] sm:$0xff] }
  0x30   :  { %575 = vmatpush3.bf16.msra.mxu0 %v574_v8  ;;  %v586_v21 = vpack.c.bf16 %v242_v20, %v241_v19  ;;  %v589_v24 = vpack.c.bf16 %v244_v23, %v243_v22  ;;  %v245_v25 = vld [vmem:[#allocation3 + $0x60] sm:$0xff]  ;;  %v248_v29 = vld [vmem:[#allocation3 + $0x78] sm:$0xff]  ;;  %v333_v40 = vld [vmem:[#allocation5 + $0x30] sm:$0xff] }
  0x31   :  { %576 = vmatprep.subr.bf16.mxu0 %v682_v11  ;;  %v592_v27 = vpack.c.bf16 %v246_v26, %v245_v25  ;;  %v595_v30 = vpack.c.bf16 %v248_v29, %v247_v28  ;;  %v327_v31 = vld [vmem:[#allocation5] sm:$0xff]  ;;  %v330_v35 = vld [vmem:[#allocation5 + $0x18] sm:$0xff]  ;;  %v336_v44 = vld [vmem:[#allocation5 + $0x48] sm:$0xff] }
  0x32   :  { %v598_v34 = vpack.c.bf16 %v328_v32, %v327_v31  ;;  %v601_v36 = vpack.c.bf16 %v330_v35, %v329_v33  ;;  %v331_v37 = vld [vmem:[#allocation5 + $0x20] sm:$0xff]  ;;  %v334_v41 = vld [vmem:[#allocation5 + $0x38] sm:$0xff]  ;;  %v337_v46 = vld [vmem:[#allocation5 + $0x50] sm:$0xff] }
  0x33   :  { %v604_v39 = vpack.c.bf16 %v332_v38, %v331_v37  ;;  %v607_v42 = vpack.c.bf16 %v334_v41, %v333_v40  ;;  %v335_v43 = vld [vmem:[#allocation5 + $0x40] sm:$0xff]  ;;  %v338_v47 = vld [vmem:[#allocation5 + $0x58] sm:$0xff]  ;;  %v340_v50 = vld [vmem:[#allocation5 + $0x68] sm:$0xff] }
  0x34   :  { %578 = vmatpush3.bf16.msra.mxu0 %v577_v12  ;;  %599 = vmatpush3.bf16.msra.mxu1 %v598_v34  ;;  %v610_v45 = vpack.c.bf16 %v336_v44, %v335_v43  ;;  %v613_v48 = vpack.c.bf16 %v338_v47, %v337_v46  ;;  %v339_v49 = vld [vmem:[#allocation5 + $0x60] sm:$0xff]  ;;  %v450_v54 = vld [vmem:[%s821_s4] ss:$0 sm:$0xff]  ;;  %v341_v60 = vld [vmem:[#allocation5 + $0x70] sm:$0xff] }
  0x35   :  { %579 = vmatprep.subr.bf16.mxu0 %v682_v11  ;;  %600 = vmatprep.subr.bf16.mxu1 %v682_v11  ;;  %v616_v51 = vpack.c.bf16 %v340_v50, %v339_v49  ;;  %v342_v61 = vld [vmem:[#allocation5 + $0x78] sm:$0xff] }
  0x36   :  { %v619_v62 = vpack.c.bf16 %v342_v61, %v341_v60  ;;  %v451_v63 = vld [vmem:[%s823_s6] ss:$0 sm:$0xff] }
  0x37   :  { %v452_v4 = vld [vmem:[%s825_s8] ss:$0 sm:$0xff] }
  0x38   :  { %581 = vmatpush3.bf16.msra.mxu0 %v580_v15  ;;  %602 = vmatpush3.bf16.msra.mxu1 %v601_v36  ;;  %v453_v8 = vld [vmem:[%s826_s9] ss:$0 sm:$0xff] }
  0x39   :  { %582 = vmatprep.subr.bf16.mxu0 %v682_v11  ;;  %603 = vmatprep.subr.bf16.mxu1 %v682_v11 }
  0x3c   :  { %584 = vmatpush3.bf16.msra.mxu0 %v583_v18  ;;  %605 = vmatpush3.bf16.msra.mxu1 %v604_v39 }
  0x3d   :  { %585 = vmatprep.subr.bf16.mxu0 %v682_v11  ;;  %606 = vmatprep.subr.bf16.mxu1 %v682_v11 }
  0x40   :  { %587 = vmatpush3.bf16.msra.mxu0 %v586_v21  ;;  %608 = vmatpush3.bf16.msra.mxu1 %v607_v42 }
  0x41   :  { %588 = vmatprep.subr.bf16.mxu0 %v682_v11  ;;  %609 = vmatprep.subr.bf16.mxu1 %v682_v11 }
  0x44   :  { %590 = vmatpush3.bf16.msra.mxu0 %v589_v24  ;;  %611 = vmatpush3.bf16.msra.mxu1 %v610_v45 }
  0x45   :  { %591 = vmatprep.subr.bf16.mxu0 %v682_v11  ;;  %612 = vmatprep.subr.bf16.mxu1 %v682_v11 }
  0x48   :  { %593 = vmatpush3.bf16.msra.mxu0 %v592_v27  ;;  %614 = vmatpush3.bf16.msra.mxu1 %v613_v48 }
  0x49   :  { %594 = vmatprep.subr.bf16.mxu0 %v682_v11  ;;  %615 = vmatprep.subr.bf16.mxu1 %v682_v11 }
  0x4c   :  { %596 = vmatpush3.bf16.msra.mxu0 %v595_v30  ;;  %617 = vmatpush3.bf16.msra.mxu1 %v616_v51 }
  0x4d   :  { %618 = vmatprep.subr.bf16.mxu1 %v682_v11  ;;  %v454_v11 = vld [vmem:[#allocation2] ss:$0 sm:$0xff] }
  0x50   :  { %620 = vmatpush3.bf16.msra.mxu1 %v619_v62 }
  0xff   :  { %v146_v52 = vpop.f32.mrb[0].mxu0 }
 0x100   :  { %v220_v53 = vpop.f32.mrb[0].mxu1  ;;  %v497_v56 = vpop.f32.mrb[1].mxu0 }
 0x101   :  { %v221_v55 = vadd.f32 %v220_v53, %v146_v52  ;;  %v502_v57 = vpop.f32.mrb[1].mxu1 }
 0x103   :  { %v231_v58 = vadd.f32 %v450_v54, %v221_v55 }
 0x105   :  { %v232_v59 = vmax.f32 %v231_v58, 0.0 }
 0x107   :  { %536 = vmatmul.mubr.f32.vlgmr.msra.gmra.mrb[2].mxu0 %v232_v59 }
 0x1da   :  { %v322_v0 = vpop.f32.mrb[2].mxu0 }
 0x1db   :  { %v323_v1 = vadd.f32 %v451_v63, %v322_v0  ;;  %v537_v2 = vpop.f32.mrb[3].mxu0 }
 0x1dd   :  { %v326_v3 = vmax.f32 %v323_v1, 0.0 }
 0x1df   :  { %571 = vmatmul.mubr.f32.vlgmr.msra.gmra.mrb[2].mxu1 %v326_v3 }
 0x2b2   :  { %v416_v5 = vpop.f32.mrb[2].mxu1 }
 0x2b3   :  { %v417_v6 = vadd.f32 %v452_v4, %v416_v5  ;;  %v572_v7 = vpop.f32.mrb[3].mxu1 }
 0x2b5   :  { %v420_v9 = vmax.f32 %v417_v6, 0.0 }
 0x2b7   :  { %v428_v10 = vmul.f32 %v453_v8, %v420_v9 }
 0x2b9   :  { %429 = vadd.xlane.f32.xlu0 %v428_v10 }
 0x346   :  { %v430_v12 = vpop.xlane.xlu0 %429 }
 0x347   :  { %v438_v13 = vadd.f32 %v454_v11, %v430_v12 }
 0x349   :  { %440 = vst.msk [vmem:[%s828_s11] sm:$0xff] %vm439_vm4, %v438_v13 }
 0x34a   :  { %445 = vsyncpa [#allocation4], 1 }
 0x34b   :  { %446 = vsyncpa [#allocation6], 1 }

</bundles_post_ra>
